<compile_context>
chip_gen: v7x
topology: tpu7x:2x2x1
jax: 0.10.0
libtpu: 0.0.40
codegen_flags: <defaults>
</compile_context>

<pallas_src>
import functools

import jax
import jax.numpy as jnp
from jax import lax
from jax.experimental import pallas as pl
from jax.experimental.pallas import tpu as pltpu


_LANES = 128       # TPU vreg lane width; 32 quaternions per row
_MAX_ROWS = 2048   # rows per (TR, 128) block; f32 => 1 MiB per input per buffer


def _round_up(x, m):
    return ((x + m - 1) // m) * m


def _num_tensorcores():
    """2 on dual-TensorCore chips (v4 / v5p / v7x), 1 on v5e / v6e."""
    try:
        kind = jax.devices()[0].device_kind.lower()
    except Exception:
        return 1
    if "v4" in kind or "v5p" in kind or "v7" in kind:
        return 2
    return 1


def _group_sum4(x):
    """Sum of each aligned group of 4 lanes; valid at lanes l with l % 4 == 0."""
    y = x + pltpu.roll(x, 126, 1)      # y[l] = x[l] + x[l+2]
    return y + pltpu.roll(y, 127, 1)   # g[l] = x[l] + x[l+1] + x[l+2] + x[l+3]


def _quat_loss_kernel(pred_ref, target_ref, out_ref, *,
                      alpha, beta, batch, tile_rows, ntiles, mask_tail):
    c = pl.program_id(0)      # "parallel" core axis
    i = pl.program_id(1)      # "arbitrary" reduction axis

    # Zero this core's resident accumulator block at the start of its reduction.
    @pl.when(i == 0)
    def _():
        out_ref[...] = jnp.zeros_like(out_ref)

    # DMA at input dtype; cast to f32 on the VPU (free under the DMA).
    pred = pred_ref[...].astype(jnp.float32)      # (TR, 128): 32 quats per row
    target = target_ref[...].astype(jnp.float32)

    term = jnp.zeros((tile_rows, _LANES), jnp.float32)

    # alpha/beta are Python floats -> dead branches removed at trace time.
    if alpha != 0.0 or beta != 0.0:
        pn = jnp.sqrt(_group_sum4(pred * pred))        # valid at lanes % 4 == 0
        tn = jnp.sqrt(_group_sum4(target * target))

    if alpha != 0.0:
        d = pn - tn
        term = term + alpha * (d * d)

    if beta != 0.0:           # statically elided for the default beta=0
        dot = _group_sum4(pred * target)
        cos = dot / (pn * tn + 1e-8)                   # same eps as the module
        term = term + beta * (1.0 - cos)

    # Keep only the lanes holding per-quaternion results (lane % 4 == 0).
    lane = lax.broadcasted_iota(jnp.int32, (tile_rows, _LANES), 1)
    keep = (lane & 3) == 0
    if mask_tail:
        # Zero-padded quats only matter for the cosine term (1 - 0 != 0).
        row = lax.broadcasted_iota(jnp.int32, (tile_rows, _LANES), 0)
        elem = (c * ntiles + i) * (tile_rows * _LANES) + row * _LANES + lane
        keep = jnp.logical_and(keep, elem < batch * 4)
    term = jnp.where(keep, term, 0.0)

    # Lane-parallel accumulation: one sublane reduce per tile, no per-step
    # cross-lane tree + scalar broadcast.
    out_ref[...] += jnp.sum(term, axis=0, keepdims=True)


def quaternion_regression_loss(pred, target, alpha=4.0, beta=0.0):
    """pred/target: (B, 4) arrays. Returns the scalar float32 loss."""
    assert pred.shape == target.shape and pred.ndim == 2 and pred.shape[1] == 4
    B = pred.shape[0]
    alpha = float(alpha)
    beta = float(beta)

    # Row alignment for the (rows, 128) blocks: 8 for 4-byte dtypes,
    # 16 for 2-byte, 32 for 1-byte (sublane packing).
    itemsize = int(jnp.dtype(pred.dtype).itemsize)
    row_align = 8 * max(1, 4 // max(itemsize, 1))

    nc = _num_tensorcores()
    rows_needed = max(pl.cdiv(B * 4, _LANES), 1)
    if rows_needed < nc * row_align:
        nc = 1                                    # tiny batch: skip the core split
    tile_rows = min(_round_up(pl.cdiv(rows_needed, nc), row_align), _MAX_ROWS)
    ntiles = pl.cdiv(rows_needed, nc * tile_rows)
    rows_pad = nc * ntiles * tile_rows
    flat_len = rows_pad * _LANES

    def prep(x):
        flat = x.reshape(-1)             # contiguous reinterpretation: no transpose
        if flat.shape[0] != flat_len:    # only ragged tails pay a pad copy
            flat = jnp.pad(flat, (0, flat_len - flat.shape[0]))
        return flat.reshape(rows_pad, _LANES)

    pred_r = prep(pred)
    target_r = prep(target)

    # Zero-padded quats give pn = tn = 0 so the alpha term is exactly 0;
    # only the cosine term needs the ragged-tail mask.
    mask_tail = (beta != 0.0) and (flat_len != B * 4)

    kernel = functools.partial(
        _quat_loss_kernel, alpha=alpha, beta=beta, batch=B,
        tile_rows=tile_rows, ntiles=ntiles, mask_tail=mask_tail)

    in_spec = pl.BlockSpec((tile_rows, _LANES), lambda c, i: (c * ntiles + i, 0))
    partials = pl.pallas_call(
        kernel,
        out_shape=jax.ShapeDtypeStruct((1, nc * _LANES), jnp.float32),
        grid=(nc, ntiles),
        in_specs=[in_spec, in_spec],
        out_specs=pl.BlockSpec((1, _LANES), lambda c, i: (0, c)),
        compiler_params=pltpu.CompilerParams(
            dimension_semantics=("parallel", "arbitrary")),
    )(pred_r, target_r)

    # Non-quaternion lanes were zeroed in-kernel; one small host-side reduce.
    return jnp.sum(partials) / B


def _reference_loss(pred, target, alpha=4.0, beta=0.0):
    pred = pred.astype(jnp.float32)
    target = target.astype(jnp.float32)
    pn = jnp.sqrt(jnp.sum(pred ** 2, axis=1))
    tn = jnp.sqrt(jnp.sum(target ** 2, axis=1))
    norm_loss = jnp.mean((pn - tn) ** 2)
    dot = jnp.sum(pred * target, axis=1)
    cos = dot / (pn * tn + 1e-8)
    cosine_loss = jnp.mean(1.0 - cos)
    return alpha * norm_loss + beta * cosine_loss


if __name__ == "__main__":
    key = jax.random.PRNGKey(0)
    k1, k2, k3, k4, k5, k6 = jax.random.split(key, 6)

    # Case 1: constructor defaults (alpha=4.0, beta=0), tiny batch.
    B = 8
    pred = jax.random.normal(k1, (B, 4), dtype=jnp.float32)
    target = jax.random.normal(k2, (B, 4), dtype=jnp.float32)
    loss = jax.block_until_ready(quaternion_regression_loss(pred, target, 4.0, 0.0))
    ref = _reference_loss(pred, target, 4.0, 0.0)
    assert jnp.allclose(loss, ref, rtol=1e-5, atol=1e-5), (loss, ref)

    # Case 2: nonzero beta and a ragged batch (cosine branch + tail mask).
    B2 = 200
    pred2 = jax.random.normal(k3, (B2, 4), dtype=jnp.float32)
    target2 = jax.random.normal(k4, (B2, 4), dtype=jnp.float32)
    loss2 = jax.block_until_ready(quaternion_regression_loss(pred2, target2, 4.0, 0.5))
    ref2 = _reference_loss(pred2, target2, 4.0, 0.5)
    assert jnp.allclose(loss2, ref2, rtol=1e-5, atol=1e-5), (loss2, ref2)

    # Case 3: nonzero beta, batch that fills whole 128-lane rows (no tail mask).
    B3 = 256
    pred3 = jax.random.normal(k5, (B3, 4), dtype=jnp.float32)
    target3 = jax.random.normal(k6, (B3, 4), dtype=jnp.float32)
    loss3 = jax.block_until_ready(quaternion_regression_loss(pred3, target3, 4.0, 0.25))
    ref3 = _reference_loss(pred3, target3, 4.0, 0.25)
    assert jnp.allclose(loss3, ref3, rtol=1e-5, atol=1e-5), (loss3, ref3)

    print("KERNEL_OK")
</pallas_src>

<mosaic_0001>
module attributes {stable_mosaic.version = 11 : i64} {
  func.func @_quat_loss_kernel(%arg0: i32, %arg1: i32, %arg2: memref<8x128xf32, #tpu.memory_space<vmem>>, %arg3: memref<8x128xf32, #tpu.memory_space<vmem>>, %arg4: memref<1x128xf32, #tpu.memory_space<vmem>>) attributes {dimension_semantics = [#tpu.dimension_semantics<parallel>, #tpu.dimension_semantics<arbitrary>], iteration_bounds = array<i64: 1, 1>, scalar_prefetch = 0 : i64, scratch_operands = 0 : i64, tpu.core_type = #tpu.core_type<tc>, window_params = [{transform_indices = @transform_0, window_bounds = array<i64: 8, 128>}, {transform_indices = @transform_1, window_bounds = array<i64: 8, 128>}, {transform_indices = @transform_2, window_bounds = array<i64: 1, 128>}]} {
    %c0_i32 = arith.constant 0 : i32
    %0 = arith.cmpi eq, %arg1, %c0_i32 : i32
    %1 = arith.extui %0 : i1 to i32
    %c0_i32_0 = arith.constant 0 : i32
    %2 = arith.cmpi ne, %1, %c0_i32_0 : i32
    scf.if %2 {
      %cst_14 = arith.constant 0.000000e+00 : f32
      %35 = vector.broadcast %cst_14 : f32 to vector<1x128xf32>
      %c0_15 = arith.constant 0 : index
      %c0_16 = arith.constant 0 : index
      %36 = vector.load %arg4[%c0_15, %c0_16] : memref<1x128xf32, #tpu.memory_space<vmem>>, vector<1x128xf32>
      tpu.vector_store %arg4[%c0_15, %c0_16], %35 {strides = array<i32>} : memref<1x128xf32, #tpu.memory_space<vmem>>, vector<1x128xf32>,
    } else {
    }
    %c0 = arith.constant 0 : index
    %c0_1 = arith.constant 0 : index
    %3 = vector.load %arg2[%c0, %c0_1] : memref<8x128xf32, #tpu.memory_space<vmem>>, vector<8x128xf32>
    %c0_2 = arith.constant 0 : index
    %c0_3 = arith.constant 0 : index
    %4 = vector.load %arg3[%c0_2, %c0_3] : memref<8x128xf32, #tpu.memory_space<vmem>>, vector<8x128xf32>
    %cst = arith.constant 0.000000e+00 : f32
    %5 = vector.broadcast %cst : f32 to vector<8x128xf32>
    %6 = arith.mulf %3, %3 : vector<8x128xf32>
    %c126_i32 = arith.constant 126 : i32
    %7 = tpu.dynamic_rotate %6 by %c126_i32 dim 1 : vector<8x128xf32>, i32 -> vector<8x128xf32>
    %8 = arith.addf %6, %7 : vector<8x128xf32>
    %c127_i32 = arith.constant 127 : i32
    %9 = tpu.dynamic_rotate %8 by %c127_i32 dim 1 : vector<8x128xf32>, i32 -> vector<8x128xf32>
    %10 = arith.addf %8, %9 : vector<8x128xf32>
    %11 = math.sqrt %10 : vector<8x128xf32>
    %12 = arith.mulf %4, %4 : vector<8x128xf32>
    %c126_i32_4 = arith.constant 126 : i32
    %13 = tpu.dynamic_rotate %12 by %c126_i32_4 dim 1 : vector<8x128xf32>, i32 -> vector<8x128xf32>
    %14 = arith.addf %12, %13 : vector<8x128xf32>
    %c127_i32_5 = arith.constant 127 : i32
    %15 = tpu.dynamic_rotate %14 by %c127_i32_5 dim 1 : vector<8x128xf32>, i32 -> vector<8x128xf32>
    %16 = arith.addf %14, %15 : vector<8x128xf32>
    %17 = math.sqrt %16 : vector<8x128xf32>
    %18 = arith.subf %11, %17 : vector<8x128xf32>
    %19 = arith.mulf %18, %18 : vector<8x128xf32>
    %cst_6 = arith.constant 4.000000e+00 : f32
    %20 = vector.broadcast %cst_6 : f32 to vector<8x128xf32>
    %21 = arith.mulf %20, %19 : vector<8x128xf32>
    %22 = arith.addf %5, %21 : vector<8x128xf32>
    %23 = tpu.iota {dimensions = array<i32: 1>} : vector<8x128xi32>
    %c3_i32 = arith.constant 3 : i32
    %24 = vector.broadcast %c3_i32 : i32 to vector<8x128xi32>
    %25 = arith.andi %23, %24 : vector<8x128xi32>
    %c0_i32_7 = arith.constant 0 : i32
    %26 = vector.broadcast %c0_i32_7 : i32 to vector<8x128xi32>
    %27 = arith.cmpi eq, %25, %26 : vector<8x128xi32>
    %cst_8 = arith.constant 0.000000e+00 : f32
    %28 = vector.broadcast %cst_8 : f32 to vector<8x128xf32>
    %29 = arith.select %27, %22, %28 : vector<8x128xi1>, vector<8x128xf32>
    %c0_9 = arith.constant 0 : index
    %c0_10 = arith.constant 0 : index
    %30 = vector.load %arg4[%c0_9, %c0_10] : memref<1x128xf32, #tpu.memory_space<vmem>>, vector<1x128xf32>
    %cst_11 = arith.constant dense<0.000000e+00> : vector<128xf32>
    %31 = vector.multi_reduction <add>, %29, %cst_11 [0] : vector<8x128xf32> to vector<128xf32>
    %32 = vector.shape_cast %31 : vector<128xf32> to vector<1x128xf32>
    %33 = arith.addf %30, %32 : vector<1x128xf32>
    %c0_12 = arith.constant 0 : index
    %c0_13 = arith.constant 0 : index
    %34 = vector.load %arg4[%c0_12, %c0_13] : memref<1x128xf32, #tpu.memory_space<vmem>>, vector<1x128xf32>
    tpu.vector_store %arg4[%c0_12, %c0_13], %33 {strides = array<i32>} : memref<1x128xf32, #tpu.memory_space<vmem>>, vector<1x128xf32>,
    return
  }
  func.func @transform_0(%arg0: i32, %arg1: i32) -> (i32, i32) {
    %c1_i32 = arith.constant 1 : i32
    %0 = arith.muli %arg0, %c1_i32 : i32
    %1 = arith.addi %0, %arg1 : i32
    %c0_i32 = arith.constant 0 : i32
    %c0_i32_0 = arith.constant 0 : i32
    return %1, %c0_i32 : i32, i32
  }
  func.func @transform_1(%arg0: i32, %arg1: i32) -> (i32, i32) {
    %c1_i32 = arith.constant 1 : i32
    %0 = arith.muli %arg0, %c1_i32 : i32
    %1 = arith.addi %0, %arg1 : i32
    %c0_i32 = arith.constant 0 : i32
    %c0_i32_0 = arith.constant 0 : i32
    return %1, %c0_i32 : i32, i32
  }
  func.func @transform_2(%arg0: i32, %arg1: i32) -> (i32, i32) {
    %c0_i32 = arith.constant 0 : i32
    %c0_i32_0 = arith.constant 0 : i32
    return %c0_i32, %arg0 : i32, i32
  }
}

</mosaic_0001>

<bundles_post_ra>
// kernel: tpu_custom_call.1
= control target key start
LH: loop header
LB: loop body
LE: loop exit
PB: predicated region body
PF: predicated region fallthrough
CT: control target
= control target key end

     0   :  { %7 = vsyncpa [#allocation3], 0  ;;  %s252_s0 = inlined_call_operand.hbm [shape: f32[8,128], index: 0, kind: input, shape index: {}]   ;;  %s253_s1 = inlined_call_operand.hbm [shape: f32[8,128], index: 1, kind: input, shape index: {}]   ;;  %s254_s2 = inlined_call_operand.hbm [shape: f32[1,128], index: 2, kind: output, shape index: {}]  }
   0x1   :  { %8 = vsyncpa [#allocation6], 0 }
   0x2   :  { %9 = vsyncpa [#allocation4], 0  ;;  %s195_s9 = smov [#allocation2]   ;;  %s196_s11 = smov [#allocation5]  }
   0x3   :  { %s19_s10 = sshll.u32 %s195_s9, 4  ;;  %s32_s12 = sshll.u32 %s196_s11, 4  ;;  %s20_s10 = int_to_ptr.vmem [resolvable:$true] %s19_s10  ;;  %s33_s12 = int_to_ptr.vmem [resolvable:$true] %s32_s12 }
   0x4   :  { %s123_s15 = scalar_lea.hbm %s252_s0, 128 }
   0x5   :  { %p124_p0 = scmp.ne.s32.totalorder %s252_s0, %s123_s15  ;;  %p127_p1 = scmp.lt.u32.totalorder %s123_s15, %s252_s0 }
   0x7   :  { %p129_p2 = pnand %p127_p1, %p124_p0 }
   0x9   :  { %132 = shalt.err (!%p129_p2)
}
   0xa   :  { %s133_s20 = scalar_lea.vmem %s20_s10, 128  ;;  %p138_p4 = scmp.lt.s32.totalorder %s20_s10, %s20_s10 }
   0xb   :  { %p134_p3 = scmp.ne.s32.totalorder %s20_s10, %s133_s20  ;;  %p139_p5 = scmp.lt.s32.totalorder %s133_s20, %s133_s20 }
   0xd   :  { %p140_p6 = por %p139_p5, %p138_p4 }
   0xf   :  { %p141_p7 = pnand %p140_p6, %p134_p3 }
  0x11   :  { %144 = shalt.err (!%p141_p7)
}
  0x12   :  { %22 = dma.hbm_to_vmem [thread:$0]  %s252_s0, 128, %s20_s10, [#allocation3]  }
  0x13   :  { %s145_s25 = scalar_lea.hbm %s253_s1, 128 }
  0x14   :  { %p146_p8 = scmp.ne.s32.totalorder %s253_s1, %s145_s25  ;;  %p149_p9 = scmp.lt.u32.totalorder %s145_s25, %s253_s1 }
  0x16   :  { %p151_p10 = pnand %p149_p9, %p146_p8 }
  0x18   :  { %154 = shalt.err (!%p151_p10)
}
  0x19   :  { %s155_s30 = scalar_lea.vmem %s33_s12, 128  ;;  %p160_p12 = scmp.lt.s32.totalorder %s33_s12, %s33_s12 }
  0x1a   :  { %p156_p11 = scmp.ne.s32.totalorder %s33_s12, %s155_s30  ;;  %p161_p13 = scmp.lt.s32.totalorder %s155_s30, %s155_s30 }
  0x1c   :  { %p162_p0 = por %p161_p13, %p160_p12 }
  0x1e   :  { %p163_p1 = pnand %p162_p0, %p156_p11 }
  0x20   :  { %166 = shalt.err (!%p163_p1)
}
  0x21   :  { %35 = dma.hbm_to_vmem [thread:$0]  %s253_s1, 128, %s33_s12, [#allocation6]  }
  0x22   :  { %189 = dma.done.wait [#allocation3], 128  }
  0x23   :  { %190 = vsyncadd [#allocation3], 4294967168 }
  0x24   :  { %191 = dma.done.wait [#allocation6], 128  }
  0x25   :  { %192 = vsyncadd [#allocation6], 4294967168  ;;  %v49_v0 = vld [vmem:[#allocation2] sm:$0xff]  ;;  %v50_v1 = vld [vmem:[#allocation5] sm:$0xff]  ;;  %s197_s4 = smov 126   ;;  %s198_s5 = smov 127   ;;  %v83_v14 = vlaneseq }
  0x26   :  { %v51_v2 = vmul.f32 %v49_v0, %v49_v0  ;;  %v65_v3 = vmul.f32 %v50_v1, %v50_v1  ;;  %v199_v8 = vmov 0.0   ;;  %s200_s1 = smov [#allocation7]  }
  0x27   :  { %48 = vst [vmem:[#allocation7] sm:$0x1] %v199_v8  ;;  %v84_v17 = vand.u32 127, %v83_v14  ;;  %s103_s6 = sshll.u32 %s200_s1, 4  ;;  %s104_s6 = int_to_ptr.vmem [resolvable:$true] %s103_s6 }
  0x28   :  { %52 = vrot.lane.b32.xlu0 %v51_v2, %s197_s4  ;;  %s167_s7 = scalar_lea.vmem %s104_s6, 16  ;;  %s171_s8 = scalar_lea.vmem %s104_s6, 32 }
  0x29   :  { %v85_v25 = vand.u32 3, %v84_v17  ;;  %p168_p2 = scmp.ne.s32.totalorder %s104_s6, %s167_s7  ;;  %p172_p3 = scmp.lt.s32.totalorder %s104_s6, %s104_s6 }
  0x2a   :  { %p173_p4 = scmp.lt.s32.totalorder %s171_s8, %s167_s7 }
  0x2b   :  { %vm86_vm4 = vcmp.eq.s32.totalorder %v85_v25, 0 }
  0x2c   :  { %66 = vrot.lane.b32.xlu0 %v65_v3, %s197_s4  ;;  %p174_p5 = por %p173_p4, %p172_p3 }
  0x2e   :  { %v88_v35 = vld [vmem:[#allocation7] sm:$0x1]  ;;  %p175_p6 = pnand %p174_p5, %p168_p2 }
  0x9a   :  { %v53_v4 = vpop.permute.xlu0 %52 }
  0x9b   :  { %v54_v5 = vadd.f32 %v53_v4, %v51_v2 }
  0x9d   :  { %55 = vrot.lane.b32.xlu1 %v54_v5, %s198_s5 }
  0x9e   :  { %v67_v6 = vpop.permute.xlu0 %66 }
  0x9f   :  { %v68_v7 = vadd.f32 %v67_v6, %v65_v3 }
  0xa1   :  { %69 = vrot.lane.b32.xlu1 %v68_v7, %s198_s5 }
 0x10f   :  { %v56_v9 = vpop.permute.xlu1 %55 }
 0x110   :  { %v57_v10 = vadd.f32 %v56_v9, %v54_v5 }
 0x112   :  { %119 = vrsqrt.f32 %v57_v10  ;;  %vm60_vm0 = vcmp.eq.f32.partialorder %v57_v10, inf  ;;  %v63_v20 = vand.u32 2147483648, %v57_v10  ;;  %vm62_vm2 = vcmp.eq.f32.partialorder %v57_v10, 0.0 }
 0x113   :  { %v70_v11 = vpop.permute.xlu1 %69 }
 0x114   :  { %v71_v12 = vadd.f32 %v70_v11, %v68_v7 }
 0x116   :  { %121 = vrsqrt.f32 %v71_v12  ;;  %vm74_vm1 = vcmp.eq.f32.partialorder %v71_v12, inf  ;;  %v77_v21 = vand.u32 2147483648, %v71_v12  ;;  %vm76_vm3 = vcmp.eq.f32.partialorder %v71_v12, 0.0 }
 0x11c   :  { %v120_v13 = vpop.eup %119 }
 0x11d   :  { %v59_v15 = vmul.f32 %v120_v13, %v57_v10 }
 0x11f   :  { %v61_v18 = vsel %vm60_vm0, %v57_v10, %v59_v15 }
 0x120   :  { %v122_v16 = vpop.eup %121  ;;  %v64_v23 = vsel %vm62_vm2, %v63_v20, %v61_v18 }
 0x121   :  { %v73_v19 = vmul.f32 %v122_v16, %v71_v12 }
 0x123   :  { %v75_v22 = vsel %vm74_vm1, %v71_v12, %v73_v19 }
 0x124   :  { %v78_v24 = vsel %vm76_vm3, %v77_v21, %v75_v22 }
 0x125   :  { %v79_v26 = vsub.f32 %v64_v23, %v78_v24 }
 0x127   :  { %v80_v27 = vmul.f32 %v79_v26, %v79_v26 }
 0x129   :  { %v81_v28 = vmul.f32 4.0, %v80_v27 }
 0x12b   :  { %v87_v29 = vsel %vm86_vm4, %v81_v28, 0.0 }
 0x12c   :  { %v89_v30 = vrot.slane %v87_v29, 4 }
 0x12e   :  { %v90_v31 = vadd.f32 %v89_v30, %v87_v29 }
 0x130   :  { %v91_v32 = vrot.slane %v90_v31, 2 }
 0x132   :  { %v92_v33 = vadd.f32 %v91_v32, %v90_v31 }
 0x134   :  { %v93_v34 = vrot.slane %v92_v33, 1 }
 0x136   :  { %v94_v36 = vadd.f32 %v93_v34, %v92_v33 }
 0x138   :  { %v95_v37 = vadd.f32 %v94_v36, %v88_v35 }
 0x13a   :  { %96 = vst [vmem:[#allocation7] sm:$0x1] %v95_v37 }
 0x13b   :  { %178 = shalt.err (!%p175_p6)
}
 0x13c   :  { %s179_s11 = scalar_lea.hbm %s254_s2, 16 }
 0x13d   :  { %p180_p7 = scmp.ne.s32.totalorder %s254_s2, %s179_s11  ;;  %p183_p8 = scmp.lt.u32.totalorder %s179_s11, %s254_s2 }
 0x13f   :  { %p185_p9 = pnand %p183_p8, %p180_p7 }
 0x141   :  { %188 = shalt.err (!%p185_p9)
}
 0x142   :  { %106 = dma.vmem_to_hbm [thread:$0]  %s104_s6, 16, %s254_s2, [#allocation4]  }
 0x143   :  { %193 = dma.done.wait [#allocation4], 16  }
 0x144   :  { %194 = vsyncadd [#allocation4], 4294967280 }
 0x145   :  { %110 = vsyncpa [#allocation3], 1 }
 0x146   :  { %111 = vsyncpa [#allocation6], 1 }
 0x147   :  { %112 = vsyncpa [#allocation4], 1 }

</bundles_post_ra>
